<compile_context>
chip_gen: v7x
topology: tpu7x:2x2x1
jax: 0.10.0
libtpu: 0.0.40
codegen_flags: <defaults>
</compile_context>

<pallas_src>
import jax
import jax.numpy as jnp
from jax import lax
from jax.experimental import pallas as pl
from jax.experimental.pallas import tpu as pltpu

# -----------------------------------------------------------------------------
# Small config consistent with MultitaskSSVEP.__init__:
#   MultitaskSSVEP(num_channel=8, num_classes=4, signal_length=64,
#                  filters_n1=4, kernel_window_ssvep=7, kernel_window=5,
#                  conv_3_dilation=2, conv_4_dilation=2)
# -----------------------------------------------------------------------------
B = 2                # batch
NUM_CHANNEL = 8      # EEG channels (torch H)
SIGNAL_LEN = 64      # signal length (torch W)
F1 = 4               # filters_n1
F2 = 8               # filters_n1 * 2
NUM_CLASSES = 4
K1 = 7               # kernel_window_ssvep
K3 = 5               # kernel_window (conv_3)
K4 = 5               # kernel_window (conv_4)
DIL3 = 2
DIL4 = 2
PAD3 = DIL3 - 1
PAD4 = DIL4 - 1
W1 = SIGNAL_LEN - K1 + 1                  # conv_1 output width (58)
W3 = W1 + 2 * PAD3 - DIL3 * (K3 - 1)      # conv_3 output width (52)
W4 = W3 + 2 * PAD4 - DIL4 * (K4 - 1)      # conv_4 output width (46)
OUT_CH = 2 * NUM_CLASSES
BN_EPS = 1e-5

BH = B * NUM_CHANNEL                      # 16 rows of the packed input slab

# Packed BN-shift column layout (offsets/sizes are all multiples of 8 -> aligned slices)
SH_O1, SH_N1 = 0, F1 * BH                     # rows  0:64   conv_1 shifts
SH_O2, SH_N2 = SH_O1 + SH_N1, F1 * B          # rows 64:72   conv_2 shifts
SH_O3, SH_N3 = SH_O2 + SH_N2, F2 * B          # rows 72:88   conv_3 shifts
SH_O4, SH_N4 = SH_O3 + SH_N3, F2 * B          # rows 88:104  conv_4 shifts
SH_ROWS = SH_O4 + SH_N4                       # 104

# Block-index math uses shifts/ands (guaranteed Mosaic vector lowering).
assert B & (B - 1) == 0 and OUT_CH & (OUT_CH - 1) == 0
B_SHIFT = B.bit_length() - 1
OC_SHIFT = OUT_CH.bit_length() - 1


def _elu(v):
    # clamp the exp argument so the masked-off positive branch can't overflow
    return jnp.where(v > 0, v, jnp.exp(jnp.minimum(v, 0.0)) - 1.0)


def ssvep_kernel(x_ref,                       # (B*H, W)            VMEM
                 w1_ref,                      # (F1*BH, K1*BH)      scale-folded
                 w2_ref,                      # (F1*B,  F1*BH)      scale-folded
                 w3_ref,                      # (F2*B,  K3*F1*B)    scale-folded
                 w4_ref,                      # (F2*B,  K4*F2*B)    scale-folded
                 wm_ref,                      # (W4, F2*OUT_CH)     lane-dense mtl weights
                 sh_ref,                      # (SH_ROWS, 1)        packed BN shifts
                 bm_ref,                      # (1, OUT_CH)
                 out_ref):                    # (B, OUT_CH)
    f32 = jnp.float32
    x2d = x_ref[...]                                                       # (16, 64)

    # Per-row BN shifts, packed into one operand; static 8-aligned row slices.
    t1 = sh_ref[SH_O1:SH_O1 + SH_N1, :]                                    # (64, 1)
    t2 = sh_ref[SH_O2:SH_O2 + SH_N2, :]                                    # (8, 1)
    t3 = sh_ref[SH_O3:SH_O3 + SH_N3, :]                                    # (16, 1)
    t4 = sh_ref[SH_O4:SH_O4 + SH_N4, :]                                    # (16, 1)

    # ---- conv_1: Conv2d(1, F1, (1, K1)) + BN + ELU  (single MXU dot) ---------
    # BN scale is pre-folded into w1_ref rows; only shift + ELU remain in-kernel.
    x_stk = jnp.concatenate([x2d[:, k:k + W1] for k in range(K1)], axis=0)    # (112, 58)
    a1 = _elu(jnp.dot(w1_ref[...], x_stk, preferred_element_type=f32) + t1)   # (64, 58)

    # ---- conv_2: Conv2d(F1, F1, (H, 1)) + BN + ELU (collapses H) -------------
    a2 = _elu(jnp.dot(w2_ref[...], a1, preferred_element_type=f32) + t2)      # (8, 58)
    # dropout: identity in inference mode

    # ---- conv_3: Conv2d(F1, F2, (1, K3), pad=(0,PAD3), dil=(1,DIL3)) ---------
    zp3 = jnp.zeros((F1 * B, PAD3), f32)
    a2p = jnp.concatenate([zp3, a2, zp3], axis=1)                             # (8, 60)
    a3_in = jnp.concatenate(
        [a2p[:, k * DIL3:k * DIL3 + W3] for k in range(K3)], axis=0)          # (40, 52)
    a3 = _elu(jnp.dot(w3_ref[...], a3_in, preferred_element_type=f32) + t3)   # (16, 52)

    # ---- conv_4: Conv2d(F2, F2, (1, K4), pad=(0,PAD4), dil=(1,DIL4)) ---------
    zp4 = jnp.zeros((F2 * B, PAD4), f32)
    a3p = jnp.concatenate([zp4, a3, zp4], axis=1)                             # (16, 54)
    a4_in = jnp.concatenate(
        [a3p[:, k * DIL4:k * DIL4 + W4] for k in range(K4)], axis=0)          # (80, 46)
    a4 = _elu(jnp.dot(w4_ref[...], a4_in, preferred_element_type=f32) + t4)   # (16, 46)
    # dropout: identity in inference mode

    # ---- conv_mtl: grouped Conv2d(F2*NC, 2*NC, (1, W4), groups=NC) -----------
    # All groups see the same (F2, W4) slab, so this is a per-class linear layer:
    #   out[b, u] = sum_{ic, t} a4[ic*B + b, t] * wm[u, ic, t] + bm[u]
    # One lane-dense MXU dot + block-diagonal mask + two tiny selector dots.
    partial = jnp.dot(a4, wm_ref[...], preferred_element_type=f32)            # (16, 64)
    r_idx = lax.broadcasted_iota(jnp.int32, (F2 * B, F2 * OUT_CH), 0)
    c_idx = lax.broadcasted_iota(jnp.int32, (F2 * B, F2 * OUT_CH), 1)
    blk_diag = (r_idx >> B_SHIFT) == (c_idx >> OC_SHIFT)                      # ic == jc
    masked = jnp.where(blk_diag, partial, 0.0)                                # (16, 64)

    # Fold column blocks: csel[c, u] = 1 if c % OUT_CH == u
    cr = lax.broadcasted_iota(jnp.int32, (F2 * OUT_CH, OUT_CH), 0)
    cu = lax.broadcasted_iota(jnp.int32, (F2 * OUT_CH, OUT_CH), 1)
    csel = ((cr & (OUT_CH - 1)) == cu).astype(f32)                            # (64, 8)
    colred = jnp.dot(masked, csel, preferred_element_type=f32)                # (16, 8)

    # Fold row blocks: rsel[b, r] = 1 if r % B == b
    rb = lax.broadcasted_iota(jnp.int32, (B, F2 * B), 0)
    rr = lax.broadcasted_iota(jnp.int32, (B, F2 * B), 1)
    rsel = ((rr & (B - 1)) == rb).astype(f32)                                 # (2, 16)
    out_ref[...] = jnp.dot(rsel, colred, preferred_element_type=f32) + bm_ref[...]


def multitask_ssvep_pallas(x, p):
    """x: (B, NUM_CHANNEL, SIGNAL_LEN) float32 (same layout as the torch input)."""
    x2d = x.reshape(B * NUM_CHANNEL, SIGNAL_LEN)      # free row-major reshape
    vmem = pl.BlockSpec(memory_space=pltpu.MemorySpace.VMEM)
    out = pl.pallas_call(
        ssvep_kernel,
        out_shape=jax.ShapeDtypeStruct((B, OUT_CH), jnp.float32),
        in_specs=[vmem] * 8,
        out_specs=vmem,
    )(x2d,
      p['w1blk'], p['w2blk'], p['w3blk'], p['w4blk'],
      p['wbig'], p['shifts'], p['bm'])
    return out.reshape(B, NUM_CLASSES, 2)


# -----------------------------------------------------------------------------
# Deterministic parameter init (shapes from the torch module __init__).
# -----------------------------------------------------------------------------
def init_params(key):
    def conv_bn(k, out_ch, w_shape):
        ks = jax.random.split(k, 6)
        return dict(
            w=0.2 * jax.random.normal(ks[0], w_shape, jnp.float32),
            b=0.05 * jax.random.normal(ks[1], (out_ch,), jnp.float32),
            gamma=1.0 + 0.1 * jax.random.normal(ks[2], (out_ch,), jnp.float32),
            beta=0.1 * jax.random.normal(ks[3], (out_ch,), jnp.float32),
            mean=0.05 * jax.random.normal(ks[4], (out_ch,), jnp.float32),
            var=1.0 + 0.2 * jax.random.uniform(ks[5], (out_ch,), jnp.float32),
        )

    k1, k2, k3, k4, k5 = jax.random.split(key, 5)
    p = dict(
        c1=conv_bn(k1, F1, (F1, 1, 1, K1)),
        c2=conv_bn(k2, F1, (F1, F1, NUM_CHANNEL, 1)),
        c3=conv_bn(k3, F2, (F2, F1, 1, K3)),
        c4=conv_bn(k4, F2, (F2, F2, 1, K4)),
    )
    km = jax.random.split(k5, 2)
    p['wm'] = 0.2 * jax.random.normal(km[0], (OUT_CH, F2, 1, W4), jnp.float32)
    p['bm'] = 0.05 * jax.random.normal(km[1], (OUT_CH,), jnp.float32)
    return p


def _fold_bn(c):
    scale = c['gamma'] / jnp.sqrt(c['var'] + BN_EPS)
    shift = (c['b'] - c['mean']) * scale + c['beta']
    return scale.astype(jnp.float32), shift.astype(jnp.float32)


def pack_kernel_params(p):
    """Host-side packing: fold BN scale INTO the block (batch-diagonal) weights,
    pack the per-row BN shifts into one column operand, and build a lane-dense
    2-D mtl weight slab."""
    sc1, sh1 = _fold_bn(p['c1'])
    sc2, sh2 = _fold_bn(p['c2'])
    sc3, sh3 = _fold_bn(p['c3'])
    sc4, sh4 = _fold_bn(p['c4'])

    eye_bh = jnp.eye(BH, dtype=jnp.float32)
    eye_b = jnp.eye(B, dtype=jnp.float32)

    # conv_1: rows f*BH + r, cols k*BH + r  (r = b*H + h); BN scale folded per row.
    w1_2d = p['c1']['w'][:, 0, 0, :] * sc1[:, None]                    # (F1, K1)
    w1blk = jnp.einsum('fk,rs->frks', w1_2d, eye_bh).reshape(F1 * BH, K1 * BH)

    # conv_2: rows g*B + b, cols f*(B*H) + b*H + h  (diagonal over b).
    w2_3d = p['c2']['w'][:, :, :, 0] * sc2[:, None, None]              # (F1, F1, H)
    w2blk = jnp.einsum('gfh,bc->gbfch', w2_3d, eye_b).reshape(F1 * B, F1 * BH)

    # conv_3: rows oc*B + b, cols k*(F1*B) + c*B + b.
    w3_3d = p['c3']['w'][:, :, 0, :] * sc3[:, None, None]              # (F2, F1, K3)
    w3blk = jnp.einsum('ock,be->obkce', w3_3d, eye_b).reshape(F2 * B, K3 * F1 * B)

    # conv_4: rows oc*B + b, cols k*(F2*B) + c*B + b.
    w4_3d = p['c4']['w'][:, :, 0, :] * sc4[:, None, None]              # (F2, F2, K4)
    w4blk = jnp.einsum('ock,be->obkce', w4_3d, eye_b).reshape(F2 * B, K4 * F2 * B)

    # conv_mtl: lane-dense (W4, F2*OUT_CH) with wbig[t, ic*OUT_CH + u] = wm[u, ic, t].
    wbig = jnp.transpose(p['wm'][:, :, 0, :], (2, 1, 0)).reshape(W4, F2 * OUT_CH)

    # All BN shifts in one (104, 1) column; row layouts match the kernel slabs.
    shifts = jnp.concatenate([
        jnp.repeat(sh1, BH), jnp.repeat(sh2, B),
        jnp.repeat(sh3, B), jnp.repeat(sh4, B)])[:, None]
    assert shifts.shape == (SH_ROWS, 1)

    return dict(w1blk=w1blk, w2blk=w2blk, w3blk=w3blk, w4blk=w4blk,
                wbig=wbig, shifts=shifts, bm=p['bm'].reshape(1, OUT_CH))


# -----------------------------------------------------------------------------
# Pure-JAX reference (mirrors the torch forward in eval mode) for verification.
# -----------------------------------------------------------------------------
def reference_forward(x, p):
    dn = ('NCHW', 'OIHW', 'NCHW')

    def block(y, c, padding, dilation):
        y = lax.conv_general_dilated(y, c['w'], (1, 1), padding,
                                     rhs_dilation=dilation,
                                     dimension_numbers=dn,
                                     precision=lax.Precision.HIGHEST)
        y = y + c['b'][None, :, None, None]
        y = (y - c['mean'][None, :, None, None]) / jnp.sqrt(
            c['var'][None, :, None, None] + BN_EPS)
        y = y * c['gamma'][None, :, None, None] + c['beta'][None, :, None, None]
        return jnp.where(y > 0, y, jnp.exp(y) - 1.0)

    y = x[:, None, :, :]                                  # unsqueeze -> (B,1,H,W)
    y = block(y, p['c1'], ((0, 0), (0, 0)), (1, 1))
    y = block(y, p['c2'], ((0, 0), (0, 0)), (1, 1))
    y = block(y, p['c3'], ((0, 0), (PAD3, PAD3)), (1, DIL3))
    y = block(y, p['c4'], ((0, 0), (PAD4, PAD4)), (1, DIL4))
    yc = jnp.concatenate([y] * NUM_CLASSES, axis=1)       # cat NC copies
    ym = lax.conv_general_dilated(yc, p['wm'], (1, 1), ((0, 0), (0, 0)),
                                  dimension_numbers=dn,
                                  feature_group_count=NUM_CLASSES,
                                  precision=lax.Precision.HIGHEST)
    ym = ym + p['bm'][None, :, None, None]
    return ym.reshape(-1, NUM_CLASSES, 2)


if __name__ == "__main__":
    key = jax.random.PRNGKey(0)
    kx, kp = jax.random.split(key)
    x = jax.random.normal(kx, (B, NUM_CHANNEL, SIGNAL_LEN), jnp.float32)

    raw_params = init_params(kp)
    kern_params = pack_kernel_params(raw_params)

    y = multitask_ssvep_pallas(x, kern_params)
    y = jax.block_until_ready(y)
    assert y.shape == (B, NUM_CLASSES, 2), y.shape

    y_ref = jax.block_until_ready(reference_forward(x, raw_params))
    err = float(jnp.max(jnp.abs(y - y_ref)))
    assert jnp.allclose(y, y_ref, atol=1e-3, rtol=1e-3), ("max abs diff", err)

    print("KERNEL_OK")
</pallas_src>

<mosaic_0001>
module attributes {stable_mosaic.version = 11 : i64} {
  func.func @ssvep_kernel(%arg0: memref<16x64xf32, #tpu.memory_space<vmem>>, %arg1: memref<64x112xf32, #tpu.memory_space<vmem>>, %arg2: memref<8x64xf32, #tpu.memory_space<vmem>>, %arg3: memref<16x40xf32, #tpu.memory_space<vmem>>, %arg4: memref<16x80xf32, #tpu.memory_space<vmem>>, %arg5: memref<46x64xf32, #tpu.memory_space<vmem>>, %arg6: memref<104x1xf32, #tpu.memory_space<vmem>>, %arg7: memref<1x8xf32, #tpu.memory_space<vmem>>, %arg8: memref<2x8xf32, #tpu.memory_space<vmem>>) attributes {dimension_semantics = [], scalar_prefetch = 0 : i64, scratch_operands = 0 : i64, tpu.core_type = #tpu.core_type<tc>} {
    %c0 = arith.constant 0 : index
    %c0_0 = arith.constant 0 : index
    %0 = vector.load %arg0[%c0, %c0_0] : memref<16x64xf32, #tpu.memory_space<vmem>>, vector<16x64xf32>
    %c0_1 = arith.constant 0 : index
    %c0_2 = arith.constant 0 : index
    %1 = vector.load %arg6[%c0_1, %c0_2] : memref<104x1xf32, #tpu.memory_space<vmem>>, vector<64x1xf32>
    %c64 = arith.constant 64 : index
    %c0_3 = arith.constant 0 : index
    %2 = vector.load %arg6[%c64, %c0_3] : memref<104x1xf32, #tpu.memory_space<vmem>>, vector<8x1xf32>
    %c72 = arith.constant 72 : index
    %c0_4 = arith.constant 0 : index
    %3 = vector.load %arg6[%c72, %c0_4] : memref<104x1xf32, #tpu.memory_space<vmem>>, vector<16x1xf32>
    %c88 = arith.constant 88 : index
    %c0_5 = arith.constant 0 : index
    %4 = vector.load %arg6[%c88, %c0_5] : memref<104x1xf32, #tpu.memory_space<vmem>>, vector<16x1xf32>
    %5 = vector.extract_strided_slice %0 {offsets = [0, 0], sizes = [16, 58], strides = [1, 1]} : vector<16x64xf32> to vector<16x58xf32>
    %6 = vector.extract_strided_slice %0 {offsets = [0, 1], sizes = [16, 58], strides = [1, 1]} : vector<16x64xf32> to vector<16x58xf32>
    %7 = vector.extract_strided_slice %0 {offsets = [0, 2], sizes = [16, 58], strides = [1, 1]} : vector<16x64xf32> to vector<16x58xf32>
    %8 = vector.extract_strided_slice %0 {offsets = [0, 3], sizes = [16, 58], strides = [1, 1]} : vector<16x64xf32> to vector<16x58xf32>
    %9 = vector.extract_strided_slice %0 {offsets = [0, 4], sizes = [16, 58], strides = [1, 1]} : vector<16x64xf32> to vector<16x58xf32>
    %10 = vector.extract_strided_slice %0 {offsets = [0, 5], sizes = [16, 58], strides = [1, 1]} : vector<16x64xf32> to vector<16x58xf32>
    %11 = vector.extract_strided_slice %0 {offsets = [0, 6], sizes = [16, 58], strides = [1, 1]} : vector<16x64xf32> to vector<16x58xf32>
    %12 = tpu.concatenate %5, %6, %7, %8, %9, %10, %11 in 0 : vector<16x58xf32>, vector<16x58xf32>, vector<16x58xf32>, vector<16x58xf32>, vector<16x58xf32>, vector<16x58xf32>, vector<16x58xf32> -> vector<112x58xf32>
    %c0_6 = arith.constant 0 : index
    %c0_7 = arith.constant 0 : index
    %13 = vector.load %arg1[%c0_6, %c0_7] : memref<64x112xf32, #tpu.memory_space<vmem>>, vector<64x112xf32>
    %cst = arith.constant dense<0.000000e+00> : vector<64x58xf32>
    %14 = tpu.matmul %13, %12, %cst {dimension_numbers = #tpu.dot_dimension_numbers<[1], [0], [0], [1], [0, 0, 1, 1], [], []>} : vector<64x112xf32>, vector<112x58xf32>, vector<64x58xf32> -> vector<64x58xf32>
    %15 = vector.broadcast %1 : vector<64x1xf32> to vector<64x58xf32>
    %16 = arith.addf %14, %15 : vector<64x58xf32>
    %cst_8 = arith.constant 0.000000e+00 : f32
    %17 = vector.broadcast %cst_8 : f32 to vector<64x58xf32>
    %18 = arith.cmpf ogt, %16, %17 : vector<64x58xf32>
    %cst_9 = arith.constant 0.000000e+00 : f32
    %19 = vector.broadcast %cst_9 : f32 to vector<64x58xf32>
    %20 = arith.minimumf %16, %19 : vector<64x58xf32>
    %21 = math.exp %20 : vector<64x58xf32>
    %cst_10 = arith.constant 1.000000e+00 : f32
    %22 = vector.broadcast %cst_10 : f32 to vector<64x58xf32>
    %23 = arith.subf %21, %22 : vector<64x58xf32>
    %24 = arith.select %18, %16, %23 : vector<64x58xi1>, vector<64x58xf32>
    %c0_11 = arith.constant 0 : index
    %c0_12 = arith.constant 0 : index
    %25 = vector.load %arg2[%c0_11, %c0_12] : memref<8x64xf32, #tpu.memory_space<vmem>>, vector<8x64xf32>
    %cst_13 = arith.constant dense<0.000000e+00> : vector<8x58xf32>
    %26 = tpu.matmul %25, %24, %cst_13 {dimension_numbers = #tpu.dot_dimension_numbers<[1], [0], [0], [1], [0, 0, 1, 1], [], []>} : vector<8x64xf32>, vector<64x58xf32>, vector<8x58xf32> -> vector<8x58xf32>
    %27 = vector.broadcast %2 : vector<8x1xf32> to vector<8x58xf32>
    %28 = arith.addf %26, %27 : vector<8x58xf32>
    %cst_14 = arith.constant 0.000000e+00 : f32
    %29 = vector.broadcast %cst_14 : f32 to vector<8x58xf32>
    %30 = arith.cmpf ogt, %28, %29 : vector<8x58xf32>
    %cst_15 = arith.constant 0.000000e+00 : f32
    %31 = vector.broadcast %cst_15 : f32 to vector<8x58xf32>
    %32 = arith.minimumf %28, %31 : vector<8x58xf32>
    %33 = math.exp %32 : vector<8x58xf32>
    %cst_16 = arith.constant 1.000000e+00 : f32
    %34 = vector.broadcast %cst_16 : f32 to vector<8x58xf32>
    %35 = arith.subf %33, %34 : vector<8x58xf32>
    %36 = arith.select %30, %28, %35 : vector<8x58xi1>, vector<8x58xf32>
    %cst_17 = arith.constant 0.000000e+00 : f32
    %37 = vector.broadcast %cst_17 : f32 to vector<8x1xf32>
    %38 = tpu.concatenate %37, %36, %37 in 1 : vector<8x1xf32>, vector<8x58xf32>, vector<8x1xf32> -> vector<8x60xf32>
    %39 = vector.extract_strided_slice %38 {offsets = [0, 0], sizes = [8, 52], strides = [1, 1]} : vector<8x60xf32> to vector<8x52xf32>
    %40 = vector.extract_strided_slice %38 {offsets = [0, 2], sizes = [8, 52], strides = [1, 1]} : vector<8x60xf32> to vector<8x52xf32>
    %41 = vector.extract_strided_slice %38 {offsets = [0, 4], sizes = [8, 52], strides = [1, 1]} : vector<8x60xf32> to vector<8x52xf32>
    %42 = vector.extract_strided_slice %38 {offsets = [0, 6], sizes = [8, 52], strides = [1, 1]} : vector<8x60xf32> to vector<8x52xf32>
    %43 = vector.extract_strided_slice %38 {offsets = [0, 8], sizes = [8, 52], strides = [1, 1]} : vector<8x60xf32> to vector<8x52xf32>
    %44 = tpu.concatenate %39, %40, %41, %42, %43 in 0 : vector<8x52xf32>, vector<8x52xf32>, vector<8x52xf32>, vector<8x52xf32>, vector<8x52xf32> -> vector<40x52xf32>
    %c0_18 = arith.constant 0 : index
    %c0_19 = arith.constant 0 : index
    %45 = vector.load %arg3[%c0_18, %c0_19] : memref<16x40xf32, #tpu.memory_space<vmem>>, vector<16x40xf32>
    %cst_20 = arith.constant dense<0.000000e+00> : vector<16x52xf32>
    %46 = tpu.matmul %45, %44, %cst_20 {dimension_numbers = #tpu.dot_dimension_numbers<[1], [0], [0], [1], [0, 0, 1, 1], [], []>} : vector<16x40xf32>, vector<40x52xf32>, vector<16x52xf32> -> vector<16x52xf32>
    %47 = vector.broadcast %3 : vector<16x1xf32> to vector<16x52xf32>
    %48 = arith.addf %46, %47 : vector<16x52xf32>
    %cst_21 = arith.constant 0.000000e+00 : f32
    %49 = vector.broadcast %cst_21 : f32 to vector<16x52xf32>
    %50 = arith.cmpf ogt, %48, %49 : vector<16x52xf32>
    %cst_22 = arith.constant 0.000000e+00 : f32
    %51 = vector.broadcast %cst_22 : f32 to vector<16x52xf32>
    %52 = arith.minimumf %48, %51 : vector<16x52xf32>
    %53 = math.exp %52 : vector<16x52xf32>
    %cst_23 = arith.constant 1.000000e+00 : f32
    %54 = vector.broadcast %cst_23 : f32 to vector<16x52xf32>
    %55 = arith.subf %53, %54 : vector<16x52xf32>
    %56 = arith.select %50, %48, %55 : vector<16x52xi1>, vector<16x52xf32>
    %cst_24 = arith.constant 0.000000e+00 : f32
    %57 = vector.broadcast %cst_24 : f32 to vector<16x1xf32>
    %58 = tpu.concatenate %57, %56, %57 in 1 : vector<16x1xf32>, vector<16x52xf32>, vector<16x1xf32> -> vector<16x54xf32>
    %59 = vector.extract_strided_slice %58 {offsets = [0, 0], sizes = [16, 46], strides = [1, 1]} : vector<16x54xf32> to vector<16x46xf32>
    %60 = vector.extract_strided_slice %58 {offsets = [0, 2], sizes = [16, 46], strides = [1, 1]} : vector<16x54xf32> to vector<16x46xf32>
    %61 = vector.extract_strided_slice %58 {offsets = [0, 4], sizes = [16, 46], strides = [1, 1]} : vector<16x54xf32> to vector<16x46xf32>
    %62 = vector.extract_strided_slice %58 {offsets = [0, 6], sizes = [16, 46], strides = [1, 1]} : vector<16x54xf32> to vector<16x46xf32>
    %63 = vector.extract_strided_slice %58 {offsets = [0, 8], sizes = [16, 46], strides = [1, 1]} : vector<16x54xf32> to vector<16x46xf32>
    %64 = tpu.concatenate %59, %60, %61, %62, %63 in 0 : vector<16x46xf32>, vector<16x46xf32>, vector<16x46xf32>, vector<16x46xf32>, vector<16x46xf32> -> vector<80x46xf32>
    %c0_25 = arith.constant 0 : index
    %c0_26 = arith.constant 0 : index
    %65 = vector.load %arg4[%c0_25, %c0_26] : memref<16x80xf32, #tpu.memory_space<vmem>>, vector<16x80xf32>
    %cst_27 = arith.constant dense<0.000000e+00> : vector<16x46xf32>
    %66 = tpu.matmul %65, %64, %cst_27 {dimension_numbers = #tpu.dot_dimension_numbers<[1], [0], [0], [1], [0, 0, 1, 1], [], []>} : vector<16x80xf32>, vector<80x46xf32>, vector<16x46xf32> -> vector<16x46xf32>
    %67 = vector.broadcast %4 : vector<16x1xf32> to vector<16x46xf32>
    %68 = arith.addf %66, %67 : vector<16x46xf32>
    %cst_28 = arith.constant 0.000000e+00 : f32
    %69 = vector.broadcast %cst_28 : f32 to vector<16x46xf32>
    %70 = arith.cmpf ogt, %68, %69 : vector<16x46xf32>
    %cst_29 = arith.constant 0.000000e+00 : f32
    %71 = vector.broadcast %cst_29 : f32 to vector<16x46xf32>
    %72 = arith.minimumf %68, %71 : vector<16x46xf32>
    %73 = math.exp %72 : vector<16x46xf32>
    %cst_30 = arith.constant 1.000000e+00 : f32
    %74 = vector.broadcast %cst_30 : f32 to vector<16x46xf32>
    %75 = arith.subf %73, %74 : vector<16x46xf32>
    %76 = arith.select %70, %68, %75 : vector<16x46xi1>, vector<16x46xf32>
    %c0_31 = arith.constant 0 : index
    %c0_32 = arith.constant 0 : index
    %77 = vector.load %arg5[%c0_31, %c0_32] : memref<46x64xf32, #tpu.memory_space<vmem>>, vector<46x64xf32>
    %cst_33 = arith.constant dense<0.000000e+00> : vector<16x64xf32>
    %78 = tpu.matmul %76, %77, %cst_33 {dimension_numbers = #tpu.dot_dimension_numbers<[1], [0], [0], [1], [0, 0, 1, 1], [], []>} : vector<16x46xf32>, vector<46x64xf32>, vector<16x64xf32> -> vector<16x64xf32>
    %79 = tpu.iota {dimensions = array<i32: 0>} : vector<16x64xi32>
    %80 = tpu.iota {dimensions = array<i32: 1>} : vector<16x64xi32>
    %c1_i32 = arith.constant 1 : i32
    %81 = vector.broadcast %c1_i32 : i32 to vector<16x64xi32>
    %82 = arith.shrsi %79, %81 : vector<16x64xi32>
    %c3_i32 = arith.constant 3 : i32
    %83 = vector.broadcast %c3_i32 : i32 to vector<16x64xi32>
    %84 = arith.shrsi %80, %83 : vector<16x64xi32>
    %85 = arith.cmpi eq, %82, %84 : vector<16x64xi32>
    %cst_34 = arith.constant 0.000000e+00 : f32
    %86 = vector.broadcast %cst_34 : f32 to vector<16x64xf32>
    %87 = arith.select %85, %78, %86 : vector<16x64xi1>, vector<16x64xf32>
    %88 = tpu.iota {dimensions = array<i32: 0>} : vector<64x8xi32>
    %89 = tpu.iota {dimensions = array<i32: 1>} : vector<64x8xi32>
    %c7_i32 = arith.constant 7 : i32
    %90 = vector.broadcast %c7_i32 : i32 to vector<64x8xi32>
    %91 = arith.andi %88, %90 : vector<64x8xi32>
    %92 = arith.cmpi eq, %91, %89 : vector<64x8xi32>
    %93 = arith.extui %92 : vector<64x8xi1> to vector<64x8xi32>
    %94 = arith.sitofp %93 : vector<64x8xi32> to vector<64x8xf32>
    %cst_35 = arith.constant dense<0.000000e+00> : vector<16x8xf32>
    %95 = tpu.matmul %87, %94, %cst_35 {dimension_numbers = #tpu.dot_dimension_numbers<[1], [0], [0], [1], [0, 0, 1, 1], [], []>} : vector<16x64xf32>, vector<64x8xf32>, vector<16x8xf32> -> vector<16x8xf32>
    %96 = tpu.iota {dimensions = array<i32: 0>} : vector<2x16xi32>
    %97 = tpu.iota {dimensions = array<i32: 1>} : vector<2x16xi32>
    %c1_i32_36 = arith.constant 1 : i32
    %98 = vector.broadcast %c1_i32_36 : i32 to vector<2x16xi32>
    %99 = arith.andi %97, %98 : vector<2x16xi32>
    %100 = arith.cmpi eq, %99, %96 : vector<2x16xi32>
    %101 = arith.extui %100 : vector<2x16xi1> to vector<2x16xi32>
    %102 = arith.sitofp %101 : vector<2x16xi32> to vector<2x16xf32>
    %cst_37 = arith.constant dense<0.000000e+00> : vector<2x8xf32>
    %103 = tpu.matmul %102, %95, %cst_37 {dimension_numbers = #tpu.dot_dimension_numbers<[1], [0], [0], [1], [0, 0, 1, 1], [], []>} : vector<2x16xf32>, vector<16x8xf32>, vector<2x8xf32> -> vector<2x8xf32>
    %c0_38 = arith.constant 0 : index
    %c0_39 = arith.constant 0 : index
    %104 = vector.load %arg7[%c0_38, %c0_39] : memref<1x8xf32, #tpu.memory_space<vmem>>, vector<1x8xf32>
    %105 = vector.broadcast %104 : vector<1x8xf32> to vector<2x8xf32>
    %106 = arith.addf %103, %105 : vector<2x8xf32>
    %c0_40 = arith.constant 0 : index
    %c0_41 = arith.constant 0 : index
    %107 = vector.load %arg8[%c0_40, %c0_41] : memref<2x8xf32, #tpu.memory_space<vmem>>, vector<2x8xf32>
    tpu.vector_store %arg8[%c0_40, %c0_41], %106 {strides = array<i32>} : memref<2x8xf32, #tpu.memory_space<vmem>>, vector<2x8xf32>,
    return
  }
}

</mosaic_0001>

<bundles_post_ra>
// kernel: tpu_custom_call.1
= control target key start
LH: loop header
LB: loop body
LE: loop exit
PB: predicated region body
PF: predicated region fallthrough
CT: control target
= control target key end

     0   :  { %13 = vsyncpa [#allocation3], 0  ;;  %s1974_s0 = inlined_call_operand.hbm [shape: f32[16,64], index: 0, kind: input, shape index: {}]   ;;  %s1975_s1 = inlined_call_operand.vmem [shape: f32[64,112], index: 1, kind: input, shape index: {}]   ;;  %s1976_s2 = inlined_call_operand.hbm [shape: f32[8,64], index: 2, kind: input, shape index: {}]   ;;  %s1977_s3 = inlined_call_operand.hbm [shape: f32[16,40], index: 3, kind: input, shape index: {}]   ;;  %s1978_s4 = inlined_call_operand.hbm [shape: f32[16,80], index: 4, kind: input, shape index: {}]   ;;  %s1979_s5 = inlined_call_operand.vmem [shape: f32[46,64], index: 5, kind: input, shape index: {}]   ;;  %s1980_s6 = inlined_call_operand.vmem [shape: f32[104,1], index: 6, kind: input, shape index: {}]   ;;  %s1981_s7 = inlined_call_operand.vmem [shape: f32[1,8], index: 7, kind: input, shape index: {}]   ;;  %s1982_s8 = inlined_call_operand.hbm [shape: f32[2,8], index: 8, kind: output, shape index: {}]  }
   0x1   :  { %14 = vsyncpa [#allocation6], 0 }
   0x2   :  { %15 = vsyncpa [#allocation9], 0 }
   0x3   :  { %16 = vsyncpa [#allocation4], 0  ;;  %s1634_s27 = smov [#allocation5]   ;;  %s1635_s29 = smov [#allocation2]  }
   0x4   :  { %s37_s28 = sshll.u32 %s1634_s27, 4  ;;  %s22_s30 = sshll.u32 %s1635_s29, 4  ;;  %s38_s28 = int_to_ptr.vmem [resolvable:$true] %s37_s28  ;;  %s1700_s30 = int_to_ptr.vmem [resolvable:$true] %s22_s30 }
   0x5   :  { %s1516_s11 = scalar_lea.hbm %s1976_s2, 128 }
   0x6   :  { %p1517_p0 = scmp.ne.s32.totalorder %s1976_s2, %s1516_s11  ;;  %p1520_p1 = scmp.lt.u32.totalorder %s1516_s11, %s1976_s2 }
   0x8   :  { %p1522_p2 = pnand %p1520_p1, %p1517_p0 }
   0xa   :  { %1525 = shalt.err (!%p1522_p2)
}
   0xb   :  { %s1526_s16 = scalar_lea.vmem %s38_s28, 128  ;;  %p1531_p4 = scmp.lt.s32.totalorder %s38_s28, %s38_s28 }
   0xc   :  { %p1527_p3 = scmp.ne.s32.totalorder %s38_s28, %s1526_s16  ;;  %p1532_p5 = scmp.lt.s32.totalorder %s1526_s16, %s1526_s16 }
   0xe   :  { %p1533_p6 = por %p1532_p5, %p1531_p4 }
  0x10   :  { %p1534_p7 = pnand %p1533_p6, %p1527_p3 }
  0x12   :  { %1537 = shalt.err (!%p1534_p7)
}
  0x13   :  { %40 = dma.hbm_to_vmem [thread:$0]  %s1976_s2, 128, %s38_s28, [#allocation6]  }
  0x14   :  { %s1538_s21 = scalar_lea.hbm %s1974_s0, 256 }
  0x15   :  { %p1539_p8 = scmp.ne.s32.totalorder %s1974_s0, %s1538_s21  ;;  %p1542_p9 = scmp.lt.u32.totalorder %s1538_s21, %s1974_s0 }
  0x17   :  { %p1544_p10 = pnand %p1542_p9, %p1539_p8 }
  0x19   :  { %1547 = shalt.err (!%p1544_p10)
}
  0x1a   :  { %s1548_s26 = scalar_lea.vmem %s1700_s30, 256  ;;  %p1553_p12 = scmp.lt.s32.totalorder %s1700_s30, %s1700_s30 }
  0x1b   :  { %p1549_p11 = scmp.ne.s32.totalorder %s1700_s30, %s1548_s26  ;;  %p1554_p13 = scmp.lt.s32.totalorder %s1548_s26, %s1548_s26 }
  0x1d   :  { %p1555_p0 = por %p1554_p13, %p1553_p12 }
  0x1f   :  { %p1556_p1 = pnand %p1555_p0, %p1549_p11 }
  0x21   :  { %1559 = shalt.err (!%p1556_p1)
}
  0x22   :  { %s1636_s2 = smov 128   ;;  %s1637_s27 = smov 8  }
  0x23   :  { %28 = dma.hbm_to_vmem [thread:$0]  %s1974_s0, 256, %s1700_s30, [#allocation3], %s1636_s2, %s1636_s2, %s1637_s27  }
  0x24   :  { %s1638_s9 = smov [#allocation7]   ;;  %s1639_s11 = smov [#allocation8]  }
  0x25   :  { %s46_s10 = sshll.u32 %s1638_s9, 4  ;;  %s58_s12 = sshll.u32 %s1639_s11, 4  ;;  %s47_s10 = int_to_ptr.vmem [resolvable:$true] %s46_s10  ;;  %s1734_s12 = int_to_ptr.vmem [resolvable:$true] %s58_s12 }
  0x26   :  { %s1560_s15 = scalar_lea.hbm %s1977_s3, 256 }
  0x27   :  { %p1561_p2 = scmp.ne.s32.totalorder %s1977_s3, %s1560_s15  ;;  %p1564_p3 = scmp.lt.u32.totalorder %s1560_s15, %s1977_s3 }
  0x29   :  { %p1566_p4 = pnand %p1564_p3, %p1561_p2 }
  0x2b   :  { %1569 = shalt.err (!%p1566_p4)
}
  0x2c   :  { %s1570_s0 = scalar_lea.vmem %s47_s10, 256  ;;  %p1575_p6 = scmp.lt.s32.totalorder %s47_s10, %s47_s10 }
  0x2d   :  { %p1571_p5 = scmp.ne.s32.totalorder %s47_s10, %s1570_s0  ;;  %p1576_p7 = scmp.lt.s32.totalorder %s1570_s0, %s1570_s0 }
  0x2f   :  { %p1577_p8 = por %p1576_p7, %p1575_p6 }
  0x31   :  { %p1578_p9 = pnand %p1577_p8, %p1571_p5 }
  0x33   :  { %1581 = shalt.err (!%p1578_p9)
}
  0x34   :  { %52 = dma.hbm_to_vmem [thread:$0]  %s1977_s3, 256, %s47_s10, [#allocation6], %s1636_s2, %s1636_s2, %s1637_s27  }
  0x35   :  { %s1582_s23 = scalar_lea.hbm %s1978_s4, 256 }
  0x36   :  { %p1583_p10 = scmp.ne.s32.totalorder %s1978_s4, %s1582_s23  ;;  %p1586_p11 = scmp.lt.u32.totalorder %s1582_s23, %s1978_s4 }
  0x38   :  { %p1588_p12 = pnand %p1586_p11, %p1583_p10 }
  0x3a   :  { %1591 = shalt.err (!%p1588_p12)
}
  0x3b   :  { %s1592_s29 = scalar_lea.vmem %s1734_s12, 256  ;;  %p1597_p0 = scmp.lt.s32.totalorder %s1734_s12, %s1734_s12 }
  0x3c   :  { %p1593_p13 = scmp.ne.s32.totalorder %s1734_s12, %s1592_s29  ;;  %p1598_p1 = scmp.lt.s32.totalorder %s1592_s29, %s1592_s29 }
  0x3e   :  { %p1599_p2 = por %p1598_p1, %p1597_p0 }
  0x40   :  { %p1600_p3 = pnand %p1599_p2, %p1593_p13 }
  0x42   :  { %1603 = shalt.err (!%p1600_p3)
}
  0x43   :  { %64 = dma.hbm_to_vmem [thread:$0]  %s1978_s4, 256, %s1734_s12, [#allocation9], %s1636_s2, %s1636_s2, %s1637_s27  }
  0x44   :  { %1626 = dma.done.wait [#allocation3], 256  }
  0x45   :  { %1627 = vsyncadd [#allocation3], 4294967040 }
  0x46   :  { %1628 = dma.done.wait [#allocation6], 384  }
  0x47   :  { %1629 = vsyncadd [#allocation6], 4294966912 }
  0x48   :  { %1630 = dma.done.wait [#allocation9], 256  }
  0x49   :  { %1631 = vsyncadd [#allocation9], 4294967040  ;;  %v83_v0 = vld [vmem:[#allocation2] sm:$0xff]  ;;  %v84_v1 = vld [vmem:[#allocation2 + $0x8] sm:$0xff]  ;;  %s1640_s10 = smov 127   ;;  %s1641_s11 = smov 125  }
  0x4a   :  { %v1433_v2 = vpack.i.bf16 %v84_v1, %v83_v0  ;;  %v1307_v3 = vpack.c.bf16 %v84_v1, %v83_v0  ;;  %s1642_s13 = smov 126   ;;  %s1643_s4 = smov 124   ;;  %v136_v4 = vld [vmem:[%s1975_s1] sm:$0xff]  ;;  %vm184_vm0 = vcmask 916480   ;;  %v86_v5 = vld [vmem:[%s1980_s6 + $0x8] sm:$0xff]  ;;  %v1646_v7 = vmov 0  }
  0x4b   :  { %s1644_s2 = smov 123   ;;  %s1645_s27 = smov 122   ;;  %1199 = vmatprep.mubr.msk.f32.mxu0 %vm184_vm0, %v136_v4  ;;  %v85_v6 = vld [vmem:[%s1980_s6] sm:$0xff]  ;;  %1464 = vset.pattern.permute.xlu1 %v1646_v7  ;;  %v87_v8 = vld [vmem:[%s1980_s6 + $0x10] sm:$0xff]  ;;  %v88_v9 = vld [vmem:[%s1980_s6 + $0x18] sm:$0xff]  ;;  %v1647_v46 = vmov 0.0|0.0  }
  0x4c   :  { %1434 = vrot.lane.b32.xlu0 %v1433_v2, %s1640_s10  ;;  %1444 = vrot.lane.b32.xlu1 %v1433_v2, %s1641_s11  ;;  %v89_v10 = vld [vmem:[%s1980_s6 + $0x20] sm:$0xff]  ;;  %v90_v11 = vld [vmem:[%s1980_s6 + $0x28] sm:$0xff]  ;;  %vm1648_vm1 = vmmov 0   ;;  %v1649_v47 = vmov 0.0   ;;  %vm368_vm10 = vcmask 523264   ;;  %vm452_vm12 = vcmask 7168  }
  0x4d   :  { %1308 = vmatprep.subr.bf16.mxu0 %v1307_v3  ;;  %1463 = vset.pattern.permute.xlu0 %v1646_v7  ;;  %v91_v12 = vld [vmem:[%s1980_s6 + $0x30] sm:$0xff]  ;;  %v92_v13 = vld [vmem:[%s1980_s6 + $0x38] sm:$0xff]  ;;  %v93_v14 = vld [vmem:[%s1980_s6 + $0x40] sm:$0xff]  ;;  %vm454_vm13 = vcmask 482304   ;;  %vm481_vm14 = vcmask 326656   ;;  %s1651_s22 = smov 120  }
  0x4e   :  { %1310 = vmatpush3.bf16.msra.mxu0 %v1307_v3  ;;  %v137_v39 = vld [vmem:[%s1975_s1 + $0x8] sm:$0xff]  ;;  %v138_v40 = vld [vmem:[%s1975_s1 + $0x10] sm:$0xff]  ;;  %v139_v41 = vld [vmem:[%s1975_s1 + $0x18] sm:$0xff]  ;;  %1335 = vmatprep.subr.bf16.mxu1 %v1647_v46  ;;  %vm1652_vm15 = vmmov 1   ;;  %s1654_s19 = smov [#allocation10]  }
  0x4f   :  { %v140_v42 = vld [vmem:[%s1975_s1 + $0x20] sm:$0xff]  ;;  %v141_v43 = vld [vmem:[%s1975_s1 + $0x28] sm:$0xff]  ;;  %v142_v44 = vld [vmem:[%s1975_s1 + $0x30] sm:$0xff]  ;;  %1227 = vmatprep.mubr.msk.f32.mxu1 %vm1648_vm1, %v1649_v47  ;;  %s1036_s0 = sshll.u32 %s1654_s19, 4  ;;  %s1037_s0 = int_to_ptr.vmem [resolvable:$true] %s1036_s0 }
  0x50   :  { %1439 = vrot.lane.b32.xlu0 %v1433_v2, %s1642_s13  ;;  %1449 = vrot.lane.b32.xlu1 %v1433_v2, %s1643_s4  ;;  %v143_v45 = vld [vmem:[%s1975_s1 + $0x38] sm:$0xff]  ;;  %s1650_s1 = smov 1   ;;  %s1604_s30 = scalar_lea.vmem %s1037_s0, 32 }
  0x51   :  { %p1605_p4 = scmp.ne.s32.totalorder %s1037_s0, %s1604_s30  ;;  %p1609_p5 = scmp.lt.s32.totalorder %s1037_s0, %s1037_s0 }
  0x52   :  { %p1610_p6 = scmp.lt.s32.totalorder %s1604_s30, %s1604_s30 }
  0x54   :  { %1454 = vrot.lane.b32.xlu0 %v1433_v2, %s1644_s2  ;;  %1459 = vrot.lane.b32.xlu1 %v1433_v2, %s1645_s27  ;;  %p1611_p7 = por %p1610_p6, %p1609_p5 }
  0x56   :  { %p1612_p8 = pnand %p1611_p7, %p1605_p4 }
  0x58   :  { %151 = vperm.xlu1 %1464, %v86_v5   ;;  %146 = vperm.xlu0 %1463, %v85_v6  }
  0x5c   :  { %156 = vperm.xlu1 %1464, %v87_v8   ;;  %161 = vperm.xlu0 %1463, %v88_v9  }
  0x60   :  { %166 = vperm.xlu1 %1464, %v89_v10   ;;  %171 = vperm.xlu0 %1463, %v90_v11  }
  0x64   :  { %176 = vperm.xlu1 %1464, %v91_v12   ;;  %181 = vperm.xlu0 %1463, %v92_v13  }
  0x68   :  { %365 = vperm.xlu1 %1464, %v93_v14  }
  0xbe   :  { %v1435_v15 = vpop.permute.xlu0 %1434  ;;  %v1445_v16 = vpop.permute.xlu1 %1444 }
  0xbf   :  { %v1437_v17 = vunpack.i.h.bf16 %v1435_v15  ;;  %v1436_v18 = vunpack.i.l.bf16 %v1435_v15  ;;  %v1447_v20 = vunpack.i.h.bf16 %v1445_v16  ;;  %v1446_v21 = vunpack.i.l.bf16 %v1445_v16 }
  0xc1   :  { %v1311_v19 = vpack.c.bf16 %v1437_v17, %v1436_v18  ;;  %v1319_v27 = vpack.c.bf16 %v1447_v20, %v1446_v21 }
  0xc2   :  { %v1440_v22 = vpop.permute.xlu0 %1439  ;;  %v1450_v23 = vpop.permute.xlu1 %1449 }
  0xc3   :  { %v1442_v24 = vunpack.i.h.bf16 %v1440_v22  ;;  %v1441_v25 = vunpack.i.l.bf16 %v1440_v22  ;;  %1312 = vmatprep.subr.bf16.mxu0 %v1311_v19  ;;  %v1452_v28 = vunpack.i.h.bf16 %v1450_v23  ;;  %v1451_v29 = vunpack.i.l.bf16 %v1450_v23 }
  0xc4   :  { %1314 = vmatpush3.bf16.msra.mxu0 %v1311_v19 }
  0xc5   :  { %v1315_v26 = vpack.c.bf16 %v1442_v24, %v1441_v25  ;;  %v1323_v31 = vpack.c.bf16 %v1452_v28, %v1451_v29 }
  0xc6   :  { %v1455_v30 = vpop.permute.xlu0 %1454  ;;  %v1460_v34 = vpop.permute.xlu1 %1459 }
  0xc7   :  { %1316 = vmatprep.subr.bf16.mxu0 %v1315_v26  ;;  %v1457_v32 = vunpack.i.h.bf16 %v1455_v30  ;;  %v1456_v33 = vunpack.i.l.bf16 %v1455_v30  ;;  %v1462_v36 = vunpack.i.h.bf16 %v1460_v34  ;;  %v1461_v37 = vunpack.i.l.bf16 %v1460_v34 }
  0xc8   :  { %1318 = vmatpush3.bf16.msra.mxu0 %v1315_v26 }
  0xc9   :  { %1320 = vmatprep.subr.bf16.mxu0 %v1319_v27  ;;  %v1327_v35 = vpack.c.bf16 %v1457_v32, %v1456_v33  ;;  %v1331_v38 = vpack.c.bf16 %v1462_v36, %v1461_v37 }
  0xcc   :  { %1322 = vmatpush3.bf16.msra.mxu0 %v1319_v27 }
  0xcd   :  { %1324 = vmatprep.subr.bf16.mxu0 %v1323_v31 }
  0xd0   :  { %1326 = vmatpush3.bf16.msra.mxu0 %v1323_v31 }
  0xd1   :  { %1328 = vmatprep.subr.bf16.mxu0 %v1327_v35 }
  0xd4   :  { %1330 = vmatpush3.bf16.msra.mxu0 %v1327_v35 }
  0xd5   :  { %1332 = vmatprep.subr.bf16.mxu0 %v1331_v38 }
  0xd7   :  { %v147_v48 = vpop.permute.xlu0 %146  ;;  %v152_v49 = vpop.permute.xlu1 %151 }
  0xd8   :  { %1334 = vmatpush3.bf16.msra.mxu0 %v1331_v38 }
  0xdb   :  { %1200 = vmatmul.mubr.msk.f32.vlgmr.msra.gmra.mrb[0].mxu0 %vm184_vm0, %v137_v39  ;;  %v162_v50 = vpop.permute.xlu0 %161  ;;  %v157_v52 = vpop.permute.xlu1 %156 }
  0xdc   :  { %1202 = vmatprep.mubr.msk.f32.mxu0 %vm184_vm0, %v138_v40 }
  0xdf   :  { %1203 = vmatmul.mubr.msk.f32.gmra.mrb[2].mxu0 %vm184_vm0, %v139_v41  ;;  %v172_v62 = vpop.permute.xlu0 %171  ;;  %v167_v1 = vpop.permute.xlu1 %166 }
  0xe0   :  { %1205 = vmatprep.mubr.msk.f32.mxu0 %vm184_vm0, %v140_v42 }
  0xe3   :  { %1206 = vmatmul.mubr.msk.f32.gmra.mrb[4].mxu0 %vm184_vm0, %v141_v43  ;;  %v182_v11 = vpop.permute.xlu0 %181  ;;  %v177_v14 = vpop.permute.xlu1 %176 }
  0xe4   :  { %1208 = vmatprep.mubr.msk.f32.mxu0 %vm184_vm0, %v142_v44 }
  0xe7   :  { %1209 = vmatmul.mubr.msk.f32.gmra.mrb[6].mxu0 %vm184_vm0, %v143_v45  ;;  %vm1348_vm0 = vmpackc.low %vm1652_vm15, %vm454_vm13 }
 0x1ae   :  { %v1201_v51 = vpop.f32.mrb[0].mxu0 }
 0x1af   :  { %v281_v53 = vadd.f32 %v1201_v51, %v152_v49  ;;  %v275_v54 = vpop.f32.mrb[1].mxu0 }
 0x1b0   :  { %v276_v55 = vadd.f32 %v275_v54, %v147_v48  ;;  %v362_v54 = vld [vmem:[#allocation5] sm:$0xff] }
 0x1b1   :  { %v323_v56 = vmin.f32 %v281_v53, 0.0  ;;  %vm315_vm2 = vcmp.gt.f32.partialorder %v281_v53, 0.0 }
 0x1b2   :  { %v322_v57 = vmin.f32 %v276_v55, 0.0  ;;  %v1204_v58 = vpop.f32.mrb[2].mxu0  ;;  %vm314_vm3 = vcmp.gt.f32.partialorder %v276_v55, 0.0 }
 0x1b3   :  { %v332_v59 = vmul.f32 1.442695, %v323_v56  ;;  %v291_v60 = vadd.f32 %v1204_v58, %v162_v50  ;;  %v285_v61 = vpop.f32.mrb[3].mxu0 }
 0x1b4   :  { %v330_v63 = vmul.f32 1.442695, %v322_v57  ;;  %v286_v0 = vadd.f32 %v285_v61, %v157_v52 }
 0x1b5   :  { %1490 = vpow2.f32 %v332_v59  ;;  %v325_v2 = vmin.f32 %v291_v60, 0.0  ;;  %vm317_vm4 = vcmp.gt.f32.partialorder %v291_v60, 0.0 }
 0x1b6   :  { %1492 = vpow2.f32 %v330_v63  ;;  %v324_v3 = vmin.f32 %v286_v0, 0.0  ;;  %v1207_v4 = vpop.f32.mrb[4].mxu0  ;;  %vm316_vm5 = vcmp.gt.f32.partialorder %v286_v0, 0.0 }
 0x1b7   :  { %v336_v5 = vmul.f32 1.442695, %v325_v2  ;;  %v301_v6 = vadd.f32 %v1207_v4, %v172_v62  ;;  %v295_v7 = vpop.f32.mrb[5].mxu0  ;;  %v95_v4 = vld [vmem:[%s1980_s6 + $0x50] sm:$0xff] }
 0x1b8   :  { %v334_v8 = vmul.f32 1.442695, %v324_v3  ;;  %v296_v9 = vadd.f32 %v295_v7, %v167_v1  ;;  %v469_v1 = vld [vmem:[#allocation7] sm:$0xff] }
 0x1b9   :  { %1494 = vpow2.f32 %v336_v5  ;;  %v327_v10 = vmin.f32 %v301_v6, 0.0  ;;  %vm319_vm6 = vcmp.gt.f32.partialorder %v301_v6, 0.0  ;;  %v94_v5 = vld [vmem:[%s1980_s6 + $0x48] sm:$0xff] }
 0x1ba   :  { %1496 = vpow2.f32 %v334_v8  ;;  %v326_v12 = vmin.f32 %v296_v9, 0.0  ;;  %v1210_v13 = vpop.f32.mrb[6].mxu0  ;;  %vm318_vm7 = vcmp.gt.f32.partialorder %v296_v9, 0.0 }
 0x1bb   :  { %v340_v15 = vmul.f32 1.442695, %v327_v10  ;;  %v311_v16 = vadd.f32 %v1210_v13, %v182_v11  ;;  %v305_v17 = vpop.f32.mrb[7].mxu0 }
 0x1bc   :  { %v338_v18 = vmul.f32 1.442695, %v326_v12  ;;  %v306_v19 = vadd.f32 %v305_v17, %v177_v14  ;;  %v470_v12 = vld [vmem:[#allocation7 + $0x8] sm:$0xff] }
 0x1bd   :  { %1498 = vpow2.f32 %v340_v15  ;;  %v329_v20 = vmin.f32 %v311_v16, 0.0  ;;  %vm321_vm8 = vcmp.gt.f32.partialorder %v311_v16, 0.0 }
 0x1be   :  { %1500 = vpow2.f32 %v338_v18  ;;  %v328_v21 = vmin.f32 %v306_v19, 0.0  ;;  %vm320_vm9 = vcmp.gt.f32.partialorder %v306_v19, 0.0 }
 0x1bf   :  { %v1491_v22 = vpop.eup %1490  ;;  %v344_v23 = vmul.f32 1.442695, %v329_v20 }
 0x1c0   :  { %v1493_v24 = vpop.eup %1492  ;;  %v342_v25 = vmul.f32 1.442695, %v328_v21  ;;  %v1056_v26 = vadd.f32 -1.0, %v1491_v22 }
 0x1c1   :  { %1502 = vpow2.f32 %v344_v23  ;;  %v1055_v27 = vadd.f32 -1.0, %v1493_v24 }
 0x1c2   :  { %1504 = vpow2.f32 %v342_v25  ;;  %v355_v28 = vsel %vm315_vm2, %v281_v53, %v1056_v26 }
 0x1c3   :  { %v1495_v29 = vpop.eup %1494  ;;  %v354_v30 = vsel %vm314_vm3, %v276_v55, %v1055_v27  ;;  %v366_v55 = vpop.permute.xlu1 %365 }
 0x1c4   :  { %v1497_v31 = vpop.eup %1496  ;;  %v1058_v32 = vadd.f32 -1.0, %v1495_v29  ;;  %v1336_v33 = vpack.c.bf16 %v355_v28, %v354_v30 }
 0x1c5   :  { %v1057_v34 = vadd.f32 -1.0, %v1497_v31 }
 0x1c6   :  { %1337 = vmatpush3.bf16.msra.mxu1 %v1336_v33  ;;  %v357_v35 = vsel %vm317_vm4, %v291_v60, %v1058_v32  ;;  %vm585_vm4 = vcmask 433152  }
 0x1c7   :  { %v1499_v36 = vpop.eup %1498  ;;  %1338 = vmatprep.subr.bf16.mxu1 %v1647_v46  ;;  %v356_v37 = vsel %vm316_vm5, %v286_v0, %v1057_v34  ;;  %vm1358_vm5 = vmpackc.low %vm585_vm4, %vm585_vm4 }
 0x1c8   :  { %v1501_v38 = vpop.eup %1500  ;;  %v1060_v39 = vadd.f32 -1.0, %v1499_v36  ;;  %v1339_v40 = vpack.c.bf16 %v357_v35, %v356_v37 }
 0x1c9   :  { %v1059_v41 = vadd.f32 -1.0, %v1501_v38 }
 0x1ca   :  { %1340 = vmatpush3.bf16.msra.mxu1 %v1339_v40  ;;  %v359_v42 = vsel %vm319_vm6, %v301_v6, %v1060_v39  ;;  %v97_v39 = vld [vmem:[%s1980_s6 + $0x60] sm:$0xff]  ;;  %v614_v40 = vld [vmem:[#allocation8] sm:$0xff]  ;;  %vm626_vm6 = vcmask 654336  }
 0x1cb   :  { %v1503_v43 = vpop.eup %1502  ;;  %1341 = vmatprep.subr.bf16.mxu1 %v1647_v46  ;;  %v358_v44 = vsel %vm318_vm7, %v296_v9, %v1059_v41  ;;  %v96_v41 = vld [vmem:[%s1980_s6 + $0x58] sm:$0xff] }
 0x1cc   :  { %v1505_v45 = vpop.eup %1504  ;;  %v1062_v48 = vadd.f32 -1.0, %v1503_v43  ;;  %v1342_v49 = vpack.c.bf16 %v359_v42, %v358_v44 }
 0x1cd   :  { %v1061_v50 = vadd.f32 -1.0, %v1505_v45 }
 0x1ce   :  { %1343 = vmatpush3.bf16.msra.mxu1 %v1342_v49  ;;  %v361_v51 = vsel %vm321_vm8, %v311_v16, %v1062_v48 }
 0x1cf   :  { %1344 = vmatprep.subr.bf16.mxu1 %v1647_v46  ;;  %v360_v52 = vsel %vm320_vm9, %v306_v19, %v1061_v50 }
 0x1d0   :  { %v1345_v53 = vpack.c.bf16 %v361_v51, %v360_v52 }
 0x1d2   :  { %1346 = vmatpush3.bf16.msra.mxu1 %v1345_v53 }
 0x1d5   :  { %1228 = vmatmul.mubr.msk.f32.vlgmr.msra.gmra.mrb[0].mxu1 %vm368_vm10, %v362_v54 }
 0x1d6   :  { %1240 = vmatprep.mubr.msk.f32.mxu1 %vm481_vm14, %v469_v1 }
 0x2a8   :  { %v438_v56 = vpop.f32.mrb[0].mxu1 }
 0x2a9   :  { %v439_v57 = vadd.f32 %v438_v56, %v366_v55  ;;  %v1229_v58 = vpop.f32.mrb[1].mxu1 }
 0x2ab   :  { %v443_v59 = vmin.f32 %v439_v57, 0.0  ;;  %vm442_vm11 = vcmp.gt.f32.partialorder %v439_v57, 0.0 }
 0x2ad   :  { %v444_v60 = vmul.f32 1.442695, %v443_v59 }
 0x2af   :  { %1506 = vpow2.f32 %v444_v60  ;;  %v615_v60 = vld [vmem:[#allocation8 + $0x8] sm:$0xff] }
 0x2b9   :  { %v1507_v61 = vpop.eup %1506 }
 0x2ba   :  { %v1064_v62 = vadd.f32 -1.0, %v1507_v61  ;;  %v720_v61 = vld [vmem:[%s1979_s5] sm:$0xff] }
 0x2bc   :  { %v447_v63 = vsel %vm442_vm11, %v439_v57, %v1064_v62  ;;  %v721_v62 = vld [vmem:[%s1979_s5 + $0x8] sm:$0xff] }
 0x2bd   :  { %449 = vrot.lane.b32.xlu0 %v447_v63, %s1650_s1  ;;  %v1379_v63 = vpack.c.bf16 %v721_v62, %v720_v61 }
 0x2bf   :  { %1380 = vmatprep.subr.bf16.mxu0 %v1379_v63 }
 0x2c0   :  { %1382 = vmatpush3.bf16.msra.mxu0 %v1379_v63 }
 0x32f   :  { %v450_v0 = vpop.permute.xlu0 %449 }
 0x330   :  { %v453_v2 = vsel %vm452_vm12, 0.0, %v450_v0  ;;  %v723_v0 = vld [vmem:[%s1979_s5 + $0x18] sm:$0xff] }
 0x331   :  { %v455_v3 = vsel %vm454_vm13, %v453_v2, 0.0 }
 0x332   :  { %460 = vrot.lane.b32.xlu0 %v455_v3, %s1643_s4  ;;  %457 = vrot.lane.b32.xlu1 %v455_v3, %s1642_s13 }
 0x336   :  { %466 = vrot.lane.b32.xlu0 %v455_v3, %s1651_s22  ;;  %463 = vrot.lane.b32.xlu1 %v455_v3, %s1645_s27  ;;  %v724_v3 = vld [vmem:[%s1979_s5 + $0x20] sm:$0xff] }
 0x33a   :  { %478 = vperm.xlu0 %1463, %v95_v4   ;;  %473 = vperm.xlu1 %1464, %v94_v5   ;;  %v725_v4 = vld [vmem:[%s1979_s5 + $0x28] sm:$0x3f] }
 0x33b   :  { %v1387_v5 = vpack.c.bf16 %v725_v4, %v724_v3 }
 0x3a4   :  { %v458_v6 = vpop.permute.xlu1 %457  ;;  %v461_v8 = vpop.permute.xlu0 %460 }
 0x3a5   :  { %v1347_v7 = vpack.c.bf16 %v458_v6, %v453_v2  ;;  %v812_v2 = vlaneseq }
 0x3a7   :  { %1349 = vmatprep.subr.msk.bf16.mxu1 %vm1348_vm0, %v1347_v7  ;;  %v1894_v6 = vshrl.u32 %v812_v2, 7 }
 0x3a8   :  { %1352 = vmatpush3.bf16.msk.msra.mxu1 %vm1348_vm0, %v1347_v7  ;;  %v464_v9 = vpop.permute.xlu1 %463  ;;  %v467_v11 = vpop.permute.xlu0 %466  ;;  %v1896_v7 = vand.u32 127, %v812_v2 }
 0x3a9   :  { %v1353_v10 = vpack.c.bf16 %v464_v9, %v461_v8  ;;  %v1899_v8 = vadd.s32 8, %v1894_v6  ;;  %v830_v9 = vand.u32 7, %v1894_v6 }
 0x3ab   :  { %1354 = vmatprep.subr.bf16.mxu1 %v1353_v10  ;;  %vm1904_vm8 = vcmp.eq.s32.totalorder %v830_v9, %v1896_v7 }
 0x3ac   :  { %1356 = vmatpush3.bf16.msra.mxu1 %v1353_v10  ;;  %v831_v10 = vand.u32 7, %v1899_v8 }
 0x3ad   :  { %1238 = vmatprep.subr.mxu1 %v467_v11 }
 0x3ae   :  { %vm1909_vm9 = vcmp.eq.s32.totalorder %v831_v10, %v1896_v7 }
 0x3af   :  { %vm1393_vm11 = vmpackc.low %vm1909_vm9, %vm1904_vm8 }
 0x3b0   :  { %1239 = vmatpush3.msra.mxu1 %v467_v11 }
 0x3b1   :  { %1241 = vmatmul.mubr.msk.f32.vlgmr.msra.gmra.mrb[2].mxu1 %vm481_vm14, %v470_v12 }
 0x3b2   :  { %1263 = vmatprep.mubr.msk.f32.mxu1 %vm626_vm6, %v614_v40  ;;  %v828_v40 = vadd.s32 48, %v1894_v6 }
 0x3b9   :  { %v479_v13 = vpop.permute.xlu0 %478  ;;  %v474_v15 = vpop.permute.xlu1 %473 }
 0x484   :  { %v1242_v14 = vpop.f32.mrb[2].mxu1 }
 0x485   :  { %v560_v16 = vadd.f32 %v1242_v14, %v479_v13  ;;  %v554_v17 = vpop.f32.mrb[3].mxu1  ;;  %v1653_v13 = vmov 1.0|1.0  }
 0x486   :  { %v555_v18 = vadd.f32 %v554_v17, %v474_v15 }
 0x487   :  { %v566_v19 = vmin.f32 %v560_v16, 0.0  ;;  %vm564_vm2 = vcmp.gt.f32.partialorder %v560_v16, 0.0 }
 0x488   :  { %v565_v20 = vmin.f32 %v555_v18, 0.0  ;;  %vm563_vm3 = vcmp.gt.f32.partialorder %v555_v18, 0.0 }
 0x489   :  { %v569_v21 = vmul.f32 1.442695, %v566_v19 }
 0x48a   :  { %v567_v22 = vmul.f32 1.442695, %v565_v20 }
 0x48b   :  { %1508 = vpow2.f32 %v569_v21 }
 0x48c   :  { %1510 = vpow2.f32 %v567_v22 }
 0x495   :  { %v1509_v23 = vpop.eup %1508 }
 0x496   :  { %v1511_v24 = vpop.eup %1510  ;;  %v1069_v25 = vadd.f32 -1.0, %v1509_v23 }
 0x497   :  { %v1068_v26 = vadd.f32 -1.0, %v1511_v24  ;;  %v824_v24 = vadd.s32 16, %v1894_v6 }
 0x498   :  { %v574_v27 = vsel %vm564_vm2, %v560_v16, %v1069_v25  ;;  %v825_v25 = vadd.s32 24, %v1894_v6 }
 0x499   :  { %v573_v28 = vsel %vm563_vm3, %v555_v18, %v1068_v26  ;;  %v832_v26 = vand.u32 7, %v824_v24 }
 0x49a   :  { %v1465_v29 = vpack.i.bf16 %v574_v27, %v573_v28  ;;  %v833_v27 = vand.u32 7, %v825_v25  ;;  %v826_v28 = vadd.s32 32, %v1894_v6 }
 0x49b   :  { %vm1927_vm13 = vcmp.eq.s32.totalorder %v832_v26, %v1896_v7 }
 0x49c   :  { %1466 = vrot.lane.b32.xlu1 %v1465_v29, %s1650_s1  ;;  %v827_v29 = vadd.s32 40, %v1894_v6  ;;  %vm1932_vm14 = vcmp.eq.s32.totalorder %v833_v27, %v1896_v7 }
 0x49d   :  { %vm1397_vm2 = vmpackc.low %vm1932_vm14, %vm1927_vm13 }
 0x50e   :  { %v1467_v30 = vpop.permute.xlu1 %1466 }
 0x50f   :  { %v1469_v31 = vunpack.i.h.bf16 %v1467_v30  ;;  %v1468_v32 = vunpack.i.l.bf16 %v1467_v30 }
 0x511   :  { %v584_v33 = vsel %vm452_vm12, 0.0, %v1469_v31  ;;  %v583_v34 = vsel %vm452_vm12, 0.0, %v1468_v32  ;;  %vm726_vm12 = vcmask 375808  }
 0x512   :  { %v587_v35 = vsel %vm585_vm4, %v584_v33, 0.0  ;;  %v586_v36 = vsel %vm585_vm4, %v583_v34, 0.0  ;;  %v1357_v37 = vpack.c.bf16 %v584_v33, %v583_v34 }
 0x513   :  { %v1475_v38 = vpack.i.bf16 %v587_v35, %v586_v36  ;;  %v834_v36 = vand.u32 7, %v826_v28 }
 0x514   :  { %1359 = vmatprep.subr.msk.bf16.mxu1 %vm1358_vm5, %v1357_v37 }
 0x515   :  { %1362 = vmatpush3.bf16.msk.msra.mxu1 %vm1358_vm5, %v1357_v37  ;;  %1476 = vrot.lane.b32.xlu1 %v1475_v38, %s1643_s4  ;;  %v835_v37 = vand.u32 7, %v827_v29  ;;  %vm842_vm3 = vcmp.eq.s32.totalorder %v834_v36, %v1896_v7 }
 0x516   :  { %1471 = vrot.lane.b32.xlu0 %v1475_v38, %s1642_s13 }
 0x517   :  { %vm843_vm4 = vcmp.eq.s32.totalorder %v835_v37, %v1896_v7 }
 0x518   :  { %vm1401_vm5 = vmpackc.low %vm843_vm4, %vm842_vm3 }
 0x519   :  { %1486 = vrot.lane.b32.xlu1 %v1475_v38, %s1651_s22 }
 0x51a   :  { %1481 = vrot.lane.b32.xlu0 %v1475_v38, %s1645_s27 }
 0x51d   :  { %623 = vperm.xlu1 %1464, %v97_v39  }
 0x51e   :  { %618 = vperm.xlu0 %1463, %v96_v41   ;;  %v829_v41 = vadd.s32 56, %v1894_v6 }
 0x587   :  { %v1477_v42 = vpop.permute.xlu1 %1476 }
 0x588   :  { %v1472_v43 = vpop.permute.xlu0 %1471  ;;  %v1479_v44 = vunpack.i.h.bf16 %v1477_v42  ;;  %v1478_v45 = vunpack.i.l.bf16 %v1477_v42  ;;  %v836_v42 = vand.u32 7, %v828_v40 }
 0x589   :  { %v1474_v48 = vunpack.i.h.bf16 %v1472_v43  ;;  %v1473_v49 = vunpack.i.l.bf16 %v1472_v43  ;;  %v837_v43 = vand.u32 7, %v829_v41 }
 0x58a   :  { %v1367_v52 = vpack.c.bf16 %v1479_v44, %v1478_v45  ;;  %v819_v44 = vshra.s32 %v1896_v7, 3  ;;  %v817_v45 = vshra.s32 %v1894_v6, 1 }
 0x58b   :  { %v1363_v50 = vpack.c.bf16 %v1474_v48, %v1473_v49  ;;  %v1487_v55 = vpop.permute.xlu1 %1486  ;;  %v818_v48 = vshra.s32 %v1899_v8, 1 }
 0x58c   :  { %v1482_v51 = vpop.permute.xlu0 %1481  ;;  %v1489_v56 = vunpack.i.h.bf16 %v1487_v55  ;;  %v1488_v57 = vunpack.i.l.bf16 %v1487_v55  ;;  %vm820_vm8 = vcmp.eq.s32.totalorder %v817_v45, %v819_v44 }
 0x58d   :  { %v1484_v53 = vunpack.i.h.bf16 %v1482_v51  ;;  %v1483_v54 = vunpack.i.l.bf16 %v1482_v51  ;;  %1364 = vmatprep.subr.bf16.mxu1 %v1363_v50  ;;  %vm821_vm9 = vcmp.eq.s32.totalorder %v818_v48, %v819_v44 }
 0x58e   :  { %1366 = vmatpush3.bf16.msra.mxu1 %v1363_v50  ;;  %v1375_v59 = vpack.c.bf16 %v1489_v56, %v1488_v57 }
 0x58f   :  { %1368 = vmatprep.subr.bf16.mxu1 %v1367_v52  ;;  %v1371_v58 = vpack.c.bf16 %v1484_v53, %v1483_v54  ;;  %v943_v53 = vand.u32 1, %v1896_v7 }
 0x592   :  { %1370 = vmatpush3.bf16.msra.mxu1 %v1367_v52 }
 0x593   :  { %1372 = vmatprep.subr.bf16.mxu1 %v1371_v58 }
 0x596   :  { %1374 = vmatpush3.bf16.msra.mxu1 %v1371_v58  ;;  %v1098_v58 = vld [vmem:[%s1981_s7] ss:$0 sm:$0xff] }
 0x597   :  { %1376 = vmatprep.subr.bf16.mxu1 %v1375_v59 }
 0x59a   :  { %1378 = vmatpush3.bf16.msra.mxu1 %v1375_v59 }
 0x59b   :  { %1409 = vmatprep.subr.bf16.mxu1 %v1647_v46  ;;  %v722_v46 = vld [vmem:[%s1979_s5 + $0x10] sm:$0xff] }
 0x59c   :  { %v1383_v1 = vpack.c.bf16 %v723_v0, %v722_v46  ;;  %v624_v14 = vpop.permute.xlu1 %623 }
 0x59d   :  { %1264 = vmatmul.mubr.msk.f32.vlgmr.msra.gmra.mrb[4].mxu1 %vm626_vm6, %v615_v60  ;;  %v619_v16 = vpop.permute.xlu0 %618  ;;  %vm844_vm6 = vcmp.eq.s32.totalorder %v836_v42, %v1896_v7 }
 0x59e   :  { %1304 = vmatprep.mubr.msk.f32.mxu1 %vm1648_vm1, %v1649_v47  ;;  %1384 = vmatprep.subr.bf16.mxu0 %v1383_v1  ;;  %vm733_vm1 = vcmask 1045504  }
 0x59f   :  { %1386 = vmatpush3.bf16.msra.mxu0 %v1383_v1  ;;  %vm1388_vm7 = vmpackc.low %vm733_vm1, %vm1652_vm15  ;;  %vm845_vm1 = vcmp.eq.s32.totalorder %v837_v43, %v1896_v7 }
 0x5a0   :  { %1389 = vmatprep.subr.msk.bf16.mxu0 %vm1388_vm7, %v1387_v5 }
 0x5a3   :  { %1392 = vmatpush3.bf16.msk.msra.mxu0 %vm1388_vm7, %v1387_v5  ;;  %vm1405_vm7 = vmpackc.low %vm845_vm1, %vm844_vm6 }
 0x5a4   :  { %1394 = vmatprep.subr.msk.bf16.mxu0 %vm1393_vm11, %v1653_v13 }
 0x670   :  { %v1265_v15 = vpop.f32.mrb[4].mxu1 }
 0x671   :  { %v705_v17 = vadd.f32 %v1265_v15, %v624_v14  ;;  %v699_v18 = vpop.f32.mrb[5].mxu1 }
 0x672   :  { %v700_v19 = vadd.f32 %v699_v18, %v619_v16 }
 0x673   :  { %v711_v20 = vmin.f32 %v705_v17, 0.0  ;;  %vm709_vm0 = vcmp.gt.f32.partialorder %v705_v17, 0.0 }
 0x674   :  { %v710_v21 = vmin.f32 %v700_v19, 0.0  ;;  %vm708_vm15 = vcmp.gt.f32.partialorder %v700_v19, 0.0 }
 0x675   :  { %v714_v22 = vmul.f32 1.442695, %v711_v20 }
 0x676   :  { %v712_v23 = vmul.f32 1.442695, %v710_v21 }
 0x677   :  { %1512 = vpow2.f32 %v714_v22 }
 0x678   :  { %1514 = vpow2.f32 %v712_v23 }
 0x681   :  { %v1513_v30 = vpop.eup %1512 }
 0x682   :  { %v1515_v31 = vpop.eup %1514  ;;  %v1075_v32 = vadd.f32 -1.0, %v1513_v30 }
 0x683   :  { %v1074_v34 = vadd.f32 -1.0, %v1515_v31 }
 0x684   :  { %v719_v39 = vsel %vm709_vm0, %v705_v17, %v1075_v32 }
 0x685   :  { %v718_v38 = vsel %vm708_vm15, %v700_v19, %v1074_v34 }
 0x686   :  { %1278 = vmatprep.mubr.msk.f32.mxu0 %vm726_vm12, %v718_v38 }
 0x687   :  { %1279 = vmatmul.mubr.msk.f32.vlgmr.msra.gmra.mrb[8].mxu0 %vm726_vm12, %v719_v39  ;;  %vm954_vm12 = vcmask 130048  }
 0x688   :  { %1396 = vmatpush3.bf16.msk.msra.mxu0 %vm1393_vm11, %v1653_v13  ;;  %vm944_vm11 = vcmp.eq.s32.totalorder %v943_v53, %v1894_v6 }
 0x689   :  { %1398 = vmatprep.subr.msk.bf16.mxu0 %vm1397_vm2, %v1653_v13  ;;  %v1097_v57 = vsel %vm944_vm11, 1.0, %v1649_v47 }
 0x68c   :  { %1400 = vmatpush3.bf16.msk.msra.mxu0 %vm1397_vm2, %v1653_v13 }
 0x68d   :  { %1402 = vmatprep.subr.msk.bf16.mxu0 %vm1401_vm5, %v1653_v13 }
 0x690   :  { %1404 = vmatpush3.bf16.msk.msra.mxu0 %vm1401_vm5, %v1653_v13 }
 0x691   :  { %1406 = vmatprep.subr.msk.bf16.mxu0 %vm1405_vm7, %v1653_v13 }
 0x694   :  { %1408 = vmatpush3.bf16.msk.msra.mxu0 %vm1405_vm7, %v1653_v13 }
 0x75a   :  { %v1280_v49 = vpop.f32.mrb[8].mxu0 }
 0x75b   :  { %v803_v50 = vpop.f32.mrb[9].mxu0  ;;  %v823_v52 = vsel %vm821_vm9, %v1280_v49, 0.0 }
 0x75c   :  { %v822_v51 = vsel %vm820_vm8, %v803_v50, 0.0 }
 0x75d   :  { %1297 = vmatprep.mubr.msk.f32.mxu0 %vm368_vm10, %v822_v51 }
 0x75e   :  { %1298 = vmatmul.mubr.msk.f32.vlgmr.msra.gmra.mrb[10].mxu0 %vm368_vm10, %v823_v52  ;;  %vm1028_vm10 = vcmask 58368  }
 0x831   :  { %v1299_v54 = vpop.f32.mrb[10].mxu0 }
 0x832   :  { %v934_v55 = vpop.f32.mrb[11].mxu0 }
 0x833   :  { %v1410_v56 = vpack.c.bf16 %v1299_v54, %v934_v55 }
 0x835   :  { %1411 = vmatpush3.bf16.msra.mxu1 %v1410_v56 }
 0x838   :  { %1305 = vmatmul.mubr.msk.f32.vlgmr.msra.gmra.mrb[6].mxu1 %vm954_vm12, %v1097_v57 }
 0x90b   :  { %v1024_v59 = vpop.f32.mrb[6].mxu1 }
 0x90c   :  { %v1025_v60 = vadd.f32 %v1098_v58, %v1024_v59  ;;  %v1306_v61 = vpop.f32.mrb[7].mxu1 }
 0x90e   :  { %1029 = vst.msk [vmem:[#allocation10] sm:$0x3] %vm1028_vm10, %v1025_v60 }
 0x90f   :  { %1615 = shalt.err (!%p1612_p8)
}
 0x910   :  { %s1616_s1 = scalar_lea.hbm %s1982_s8, 32 }
 0x911   :  { %p1617_p9 = scmp.ne.s32.totalorder %s1982_s8, %s1616_s1  ;;  %p1620_p10 = scmp.lt.u32.totalorder %s1616_s1, %s1982_s8 }
 0x913   :  { %p1622_p11 = pnand %p1620_p10, %p1617_p9 }
 0x915   :  { %1625 = shalt.err (!%p1622_p11)
}
 0x916   :  { %1039 = dma.vmem_to_hbm [thread:$0]  %s1037_s0, 32, %s1982_s8, [#allocation4]  }
 0x917   :  { %1632 = dma.done.wait [#allocation4], 32  }
 0x918   :  { %1633 = vsyncadd [#allocation4], 4294967264 }
 0x919   :  { %1043 = vsyncpa [#allocation3], 1 }
 0x91a   :  { %1044 = vsyncpa [#allocation6], 1 }
 0x91b   :  { %1045 = vsyncpa [#allocation9], 1 }
 0x91c   :  { %1046 = vsyncpa [#allocation4], 1 }

</bundles_post_ra>
